<compile_context>
chip_gen: v6e
topology: v6e:2x2x1
jax: 0.10.0
libtpu: 0.0.40
codegen_flags: <defaults>
</compile_context>

<pallas_src>
import functools

import jax
import jax.numpy as jnp
from jax.experimental import pallas as pl
from jax.experimental.pallas import tpu as pltpu


def _round_up(a, m):
    return -(-a // m) * m


def _se_kernel(x_ref, w1_ref, b1_ref, w2_ref, b2_ref, o_ref, acc_ref,
               *, hw, thw, inv_hw, has_partial):
    # x_ref:  (TN, C, THW)   streamed activation tile, native dtype, HW on lanes
    # w1_ref: (C, R_pad)     b1_ref: (1, R_pad)
    # w2_ref: (R_pad, C_pad) b2_ref: (1, C_pad)
    # o_ref:  (TN, C_pad)    acc_ref: (TN, C) f32 pooled-sum accumulator
    k = pl.program_id(1)
    nk = pl.num_programs(1)

    @pl.when(k == 0)
    def _init():
        acc_ref[...] = jnp.zeros_like(acc_ref)

    if has_partial:
        # Hot path: full tiles accumulate unmasked (no iota/cmp/select on the
        # streamed data).
        @pl.when(k < nk - 1)
        def _acc_full():
            acc_ref[...] += jnp.sum(x_ref[...].astype(jnp.float32), axis=2)

        # Last (partial) tile only: mask out-of-bounds lanes, fused into the
        # sum.  NOTE: relies on Pallas keeping the last block's origin at
        # k*thw and padding OOB lanes (which are then masked to zero here).
        @pl.when(k == nk - 1)
        def _acc_partial():
            x = x_ref[...]
            col = jax.lax.broadcasted_iota(jnp.int32, x.shape, 2)
            valid = (k * thw + col) < hw
            acc_ref[...] += jnp.sum(
                jnp.where(valid, x, jnp.zeros_like(x)).astype(jnp.float32),
                axis=2)
    else:
        acc_ref[...] += jnp.sum(x_ref[...].astype(jnp.float32), axis=2)

    @pl.when(k == nk - 1)
    def _finalize():
        pooled = acc_ref[...] * inv_hw                                 # (TN, C)
        # fc1 (1x1 conv C -> R) + SiLU
        s = jnp.dot(pooled, w1_ref[...],
                    preferred_element_type=jnp.float32) + b1_ref[...]  # (TN, R_pad)
        s = s * jax.nn.sigmoid(s)
        # fc2 (1x1 conv R -> C) + sigmoid
        e = jnp.dot(s, w2_ref[...],
                    preferred_element_type=jnp.float32) + b2_ref[...]  # (TN, C_pad)
        o_ref[...] = jax.nn.sigmoid(e).astype(o_ref.dtype)


def squeeze_and_excitation(x, w1, b1, w2, b2, *, tn=None, thw=None):
    """x: (N, C, H, W) NCHW.  w1: (R, C) 1x1-conv weight (squeezed), b1: (R,),
    w2: (C, R), b2: (C,).  Returns (N, C, 1, 1)."""
    N, C, H, W = x.shape
    R = w1.shape[0]
    HW = H * W
    itemsize = jnp.dtype(x.dtype).itemsize

    # Free reshape of contiguous NCHW -- no transpose pass over x in HBM.
    x_nchw = x.reshape(N, C, HW)

    # Pad the fc1 output dim to >=8 sublanes (contraction dim of fc2) and the
    # final channel dim to a 128-lane multiple (lane-dense output stores).
    # Zero padding is exact: padded fc1 columns give silu(0+0)=0 which hits
    # zero rows of w2; padded output columns are sliced off below.
    R_pad = max(8, _round_up(R, 8))
    C_pad = _round_up(C, 128)

    w1_t = jnp.zeros((C, R_pad), jnp.float32).at[:, :R].set(w1.T.astype(jnp.float32))
    b1_p = jnp.zeros((1, R_pad), jnp.float32).at[:, :R].set(b1.astype(jnp.float32))
    w2_t = jnp.zeros((R_pad, C_pad), jnp.float32).at[:R, :C].set(w2.T.astype(jnp.float32))
    b2_p = jnp.zeros((1, C_pad), jnp.float32).at[:, :C].set(b2.astype(jnp.float32))

    # ---- tile sizing (layout-padding + generation aware) -------------------
    # Batch tile: min(N, 8) gives grid[0] >= 2 whenever N > 8, which keeps
    # both v7x TensorCores streaming HW for realistic batch sizes.
    # TODO(synk): for N <= 8 on v7x, split the HW reduction itself across the
    # two TensorCores (two partial accumulators + tiny combine epilogue).
    if tn is None:
        tn = min(N, 8)
    tn = max(1, min(int(tn), N))

    # Physical VMEM per core: 128 MiB on v5e/v6e, 64 MiB on v7x.
    try:
        vmem_phys = int(getattr(pltpu.get_tpu_info(), "vmem_capacity_bytes",
                                64 * 1024 * 1024))
    except Exception:  # no hardware info available -> assume the smallest
        vmem_phys = 64 * 1024 * 1024
    if vmem_phys >= 96 * 1024 * 1024:        # v5e / v6e (128 MiB physical)
        vmem_limit = 64 * 1024 * 1024
        x_db_budget = 32 * 1024 * 1024       # x double-buffer budget
    else:                                    # v7x (64 MiB physical per TC)
        vmem_limit = 48 * 1024 * 1024
        x_db_budget = 24 * 1024 * 1024

    # Fixed VMEM (weights/bias/output double-buffered + accumulator), with
    # sublane(8)/lane(128) padding applied.
    fixed_vmem = (
        2 * 4 * (_round_up(C, 8) * _round_up(R_pad, 128)       # w1
                 + 8 * _round_up(R_pad, 128)                   # b1
                 + _round_up(R_pad, 8) * C_pad                 # w2
                 + 8 * C_pad)                                  # b2
        + 2 * _round_up(tn, 8) * C_pad * itemsize              # out block
        + 4 * _round_up(tn, 8) * _round_up(C, 128))            # acc scratch
    x_db_budget = max(1 * 1024 * 1024, x_db_budget - fixed_vmem)

    # Real bytes of one streamed x tile:
    #   tn * round_up(C, sublane_pack) * round_up(thw, 128) * itemsize
    # (NOT tn*C*thw*itemsize -- padding-aware budget per perf review).
    sub_pack = max(8, 32 // itemsize)        # f32 -> 8, bf16 -> 16, int8 -> 32
    lane_cost = 2 * tn * _round_up(C, sub_pack) * itemsize     # 2 = double buffer
    thw_max = max(128, (x_db_budget // (lane_cost * 128)) * 128)

    if thw is None:
        if HW <= thw_max:
            thw = HW                          # single spatial tile, no mask
        else:
            thw = thw_max
            # Try to snap down to a 128-multiple that divides HW exactly so
            # the partial-tile mask path is never generated.
            for cand in range(thw, max(127, thw - 64 * 128), -128):
                if HW % cand == 0:
                    thw = cand
                    break
    else:
        thw = int(thw)
        if thw >= HW:
            thw = HW
        else:
            thw = max(128, (thw // 128) * 128)   # lane-aligned blocks only

    has_partial = (HW % thw) != 0
    grid = (pl.cdiv(N, tn), pl.cdiv(HW, thw))

    kernel = functools.partial(_se_kernel, hw=HW, thw=thw, inv_hw=1.0 / HW,
                               has_partial=has_partial)

    cost = pl.CostEstimate(
        flops=N * HW * C + 2 * N * (C * R_pad + R_pad * C_pad),
        transcendentals=2 * N * (R_pad + C_pad),
        bytes_accessed=N * HW * C * itemsize
        + (w1_t.size + b1_p.size + w2_t.size + b2_p.size) * 4
        + N * C_pad * itemsize,
    )

    out = pl.pallas_call(
        kernel,
        out_shape=jax.ShapeDtypeStruct((N, C_pad), x.dtype),
        grid_spec=pltpu.PrefetchScalarGridSpec(
            num_scalar_prefetch=0,
            grid=grid,
            in_specs=[
                pl.BlockSpec((tn, C, thw), lambda i, k: (i, 0, k)),
                pl.BlockSpec((C, R_pad), lambda i, k: (0, 0)),
                pl.BlockSpec((1, R_pad), lambda i, k: (0, 0)),
                pl.BlockSpec((R_pad, C_pad), lambda i, k: (0, 0)),
                pl.BlockSpec((1, C_pad), lambda i, k: (0, 0)),
            ],
            out_specs=pl.BlockSpec((tn, C_pad), lambda i, k: (i, 0)),
            scratch_shapes=[pltpu.VMEM((tn, C), jnp.float32)],
        ),
        compiler_params=pltpu.CompilerParams(
            dimension_semantics=("parallel", "arbitrary"),
            vmem_limit_bytes=vmem_limit,
        ),
        cost_estimate=cost,
    )(x_nchw, w1_t, b1_p, w2_t, b2_p)

    return out[:, :C].reshape(N, C, 1, 1)


def _reference(x, w1, b1, w2, b2):
    # Pure-JAX reference of the PyTorch forward.
    pooled = jnp.mean(x, axis=(2, 3))                  # (N, C)
    s = pooled @ w1.T + b1                             # (N, R)
    s = s * jax.nn.sigmoid(s)
    e = s @ w2.T + b2                                  # (N, C)
    return jax.nn.sigmoid(e)[:, :, None, None]


if __name__ == "__main__":
    key = jax.random.PRNGKey(0)
    N, C, H, W = 2, 4, 16, 16
    R = 2  # reduced_features

    kx, kw1, kb1, kw2, kb2 = jax.random.split(key, 5)
    x = jax.random.normal(kx, (N, C, H, W), dtype=jnp.float32)
    # Conv2d(in=C, out=R, k=1) weight (R, C, 1, 1) -> stored as (R, C)
    w1 = jax.random.normal(kw1, (R, C), dtype=jnp.float32) * 0.5
    b1 = jax.random.normal(kb1, (R,), dtype=jnp.float32) * 0.1
    # Conv2d(in=R, out=C, k=1) weight (C, R, 1, 1) -> stored as (C, R)
    w2 = jax.random.normal(kw2, (C, R), dtype=jnp.float32) * 0.5
    b2 = jax.random.normal(kb2, (C,), dtype=jnp.float32) * 0.1

    # Default tiling (single spatial tile at this small size).
    ref = _reference(x, w1, b1, w2, b2)
    out = jax.block_until_ready(squeeze_and_excitation(x, w1, b1, w2, b2))
    assert out.shape == (N, C, 1, 1), out.shape
    assert jnp.allclose(out, ref, atol=1e-5, rtol=1e-5), (out, ref)

    # Larger spatial extent with a forced 128-aligned thw that does NOT divide
    # HW: exercises the multi-step accumulation path and the gated
    # partial-tile masking on the last spatial tile.
    H2 = W2 = 32
    x2 = jax.random.normal(kx, (N, C, H2, W2), dtype=jnp.float32)
    ref2 = _reference(x2, w1, b1, w2, b2)
    out2 = jax.block_until_ready(
        squeeze_and_excitation(x2, w1, b1, w2, b2, thw=384))
    assert jnp.allclose(out2, ref2, atol=1e-5, rtol=1e-5), (out2, ref2)

    print("KERNEL_OK")
</pallas_src>

<mosaic_0001>
module attributes {stable_mosaic.version = 11 : i64} {
  func.func @_se_kernel(%arg0: i32, %arg1: i32, %arg2: memref<2x4x256xf32, #tpu.memory_space<vmem>>, %arg3: memref<4x8xf32, #tpu.memory_space<vmem>>, %arg4: memref<1x8xf32, #tpu.memory_space<vmem>>, %arg5: memref<8x128xf32, #tpu.memory_space<vmem>>, %arg6: memref<1x128xf32, #tpu.memory_space<vmem>>, %arg7: memref<2x128xf32, #tpu.memory_space<vmem>>, %arg8: memref<2x4xf32, #tpu.memory_space<vmem>>) attributes {dimension_semantics = [#tpu.dimension_semantics<parallel>, #tpu.dimension_semantics<arbitrary>], iteration_bounds = array<i64: 1, 1>, scalar_prefetch = 0 : i64, scratch_operands = 1 : i64, tpu.core_type = #tpu.core_type<tc>, window_params = [{transform_indices = @transform_0, window_bounds = array<i64: 2, 4, 256>}, {pipeline_mode = #tpu.pipeline_mode<synchronous>, transform_indices = @transform_1, window_bounds = array<i64: 4, 8>}, {pipeline_mode = #tpu.pipeline_mode<synchronous>, transform_indices = @transform_2, window_bounds = array<i64: 1, 8>}, {pipeline_mode = #tpu.pipeline_mode<synchronous>, transform_indices = @transform_3, window_bounds = array<i64: 8, 128>}, {pipeline_mode = #tpu.pipeline_mode<synchronous>, transform_indices = @transform_4, window_bounds = array<i64: 1, 128>}, {transform_indices = @transform_5, window_bounds = array<i64: 2, 128>}]} {
    %c0_i32 = arith.constant 0 : i32
    %0 = arith.cmpi eq, %arg1, %c0_i32 : i32
    %1 = arith.extui %0 : i1 to i32
    %c0_i32_0 = arith.constant 0 : i32
    %2 = arith.cmpi ne, %1, %c0_i32_0 : i32
    scf.if %2 {
      %cst_9 = arith.constant 0.000000e+00 : f32
      %11 = vector.broadcast %cst_9 : f32 to vector<2x4xf32>
      %c0_10 = arith.constant 0 : index
      %c0_11 = arith.constant 0 : index
      %12 = vector.load %arg8[%c0_10, %c0_11] : memref<2x4xf32, #tpu.memory_space<vmem>>, vector<2x4xf32>
      tpu.vector_store %arg8[%c0_10, %c0_11], %11 {strides = array<i32>} : memref<2x4xf32, #tpu.memory_space<vmem>>, vector<2x4xf32>,
    } else {
    }
    %c0 = arith.constant 0 : index
    %c0_1 = arith.constant 0 : index
    %3 = vector.load %arg8[%c0, %c0_1] : memref<2x4xf32, #tpu.memory_space<vmem>>, vector<2x4xf32>
    %c0_2 = arith.constant 0 : index
    %c0_3 = arith.constant 0 : index
    %c0_4 = arith.constant 0 : index
    %4 = vector.load %arg2[%c0_2, %c0_3, %c0_4] : memref<2x4x256xf32, #tpu.memory_space<vmem>>, vector<2x4x256xf32>
    %cst = arith.constant dense<0.000000e+00> : vector<2x4xf32>
    %5 = vector.multi_reduction <add>, %4, %cst [2] : vector<2x4x256xf32> to vector<2x4xf32>
    %6 = arith.addf %3, %5 : vector<2x4xf32>
    %c0_5 = arith.constant 0 : index
    %c0_6 = arith.constant 0 : index
    %7 = vector.load %arg8[%c0_5, %c0_6] : memref<2x4xf32, #tpu.memory_space<vmem>>, vector<2x4xf32>
    tpu.vector_store %arg8[%c0_5, %c0_6], %6 {strides = array<i32>} : memref<2x4xf32, #tpu.memory_space<vmem>>, vector<2x4xf32>,
    %c0_i32_7 = arith.constant 0 : i32
    %8 = arith.cmpi eq, %arg1, %c0_i32_7 : i32
    %9 = arith.extui %8 : i1 to i32
    %c0_i32_8 = arith.constant 0 : i32
    %10 = arith.cmpi ne, %9, %c0_i32_8 : i32
    scf.if %10 {
      %c0_9 = arith.constant 0 : index
      %c0_10 = arith.constant 0 : index
      %11 = vector.load %arg8[%c0_9, %c0_10] : memref<2x4xf32, #tpu.memory_space<vmem>>, vector<2x4xf32>
      %cst_11 = arith.constant 3.906250e-03 : f32
      %12 = vector.broadcast %cst_11 : f32 to vector<2x4xf32>
      %13 = arith.mulf %11, %12 : vector<2x4xf32>
      %c0_12 = arith.constant 0 : index
      %c0_13 = arith.constant 0 : index
      %14 = vector.load %arg3[%c0_12, %c0_13] : memref<4x8xf32, #tpu.memory_space<vmem>>, vector<4x8xf32>
      %cst_14 = arith.constant dense<0.000000e+00> : vector<2x8xf32>
      %15 = tpu.matmul %13, %14, %cst_14 {dimension_numbers = #tpu.dot_dimension_numbers<[1], [0], [0], [1], [0, 0, 1, 1], [], []>} : vector<2x4xf32>, vector<4x8xf32>, vector<2x8xf32> -> vector<2x8xf32>
      %c0_15 = arith.constant 0 : index
      %c0_16 = arith.constant 0 : index
      %16 = vector.load %arg4[%c0_15, %c0_16] : memref<1x8xf32, #tpu.memory_space<vmem>>, vector<1x8xf32>
      %17 = vector.broadcast %16 : vector<1x8xf32> to vector<2x8xf32>
      %18 = arith.addf %15, %17 : vector<2x8xf32>
      %19 = arith.negf %18 : vector<2x8xf32>
      %20 = math.exp %19 : vector<2x8xf32>
      %cst_17 = arith.constant 1.000000e+00 : f32
      %21 = vector.broadcast %cst_17 : f32 to vector<2x8xf32>
      %22 = arith.addf %21, %20 : vector<2x8xf32>
      %23 = arith.divf %21, %22 : vector<2x8xf32>
      %24 = arith.mulf %18, %23 : vector<2x8xf32>
      %c0_18 = arith.constant 0 : index
      %c0_19 = arith.constant 0 : index
      %25 = vector.load %arg5[%c0_18, %c0_19] : memref<8x128xf32, #tpu.memory_space<vmem>>, vector<8x128xf32>
      %cst_20 = arith.constant dense<0.000000e+00> : vector<2x128xf32>
      %26 = tpu.matmul %24, %25, %cst_20 {dimension_numbers = #tpu.dot_dimension_numbers<[1], [0], [0], [1], [0, 0, 1, 1], [], []>} : vector<2x8xf32>, vector<8x128xf32>, vector<2x128xf32> -> vector<2x128xf32>
      %c0_21 = arith.constant 0 : index
      %c0_22 = arith.constant 0 : index
      %27 = vector.load %arg6[%c0_21, %c0_22] : memref<1x128xf32, #tpu.memory_space<vmem>>, vector<1x128xf32>
      %28 = vector.broadcast %27 : vector<1x128xf32> to vector<2x128xf32>
      %29 = arith.addf %26, %28 : vector<2x128xf32>
      %30 = arith.negf %29 : vector<2x128xf32>
      %31 = math.exp %30 : vector<2x128xf32>
      %cst_23 = arith.constant 1.000000e+00 : f32
      %32 = vector.broadcast %cst_23 : f32 to vector<2x128xf32>
      %33 = arith.addf %32, %31 : vector<2x128xf32>
      %34 = arith.divf %32, %33 : vector<2x128xf32>
      %c0_24 = arith.constant 0 : index
      %c0_25 = arith.constant 0 : index
      %35 = vector.load %arg7[%c0_24, %c0_25] : memref<2x128xf32, #tpu.memory_space<vmem>>, vector<2x128xf32>
      tpu.vector_store %arg7[%c0_24, %c0_25], %34 {strides = array<i32>} : memref<2x128xf32, #tpu.memory_space<vmem>>, vector<2x128xf32>,
    } else {
    }
    return
  }
  func.func @transform_0(%arg0: i32, %arg1: i32) -> (i32, i32, i32) {
    %c0_i32 = arith.constant 0 : i32
    %c0_i32_0 = arith.constant 0 : i32
    return %arg0, %c0_i32, %arg1 : i32, i32, i32
  }
  func.func @transform_1(%arg0: i32, %arg1: i32) -> (i32, i32) {
    %c0_i32 = arith.constant 0 : i32
    %c0_i32_0 = arith.constant 0 : i32
    %c0_i32_1 = arith.constant 0 : i32
    return %c0_i32, %c0_i32_0 : i32, i32
  }
  func.func @transform_2(%arg0: i32, %arg1: i32) -> (i32, i32) {
    %c0_i32 = arith.constant 0 : i32
    %c0_i32_0 = arith.constant 0 : i32
    %c0_i32_1 = arith.constant 0 : i32
    return %c0_i32, %c0_i32_0 : i32, i32
  }
  func.func @transform_3(%arg0: i32, %arg1: i32) -> (i32, i32) {
    %c0_i32 = arith.constant 0 : i32
    %c0_i32_0 = arith.constant 0 : i32
    %c0_i32_1 = arith.constant 0 : i32
    return %c0_i32, %c0_i32_0 : i32, i32
  }
  func.func @transform_4(%arg0: i32, %arg1: i32) -> (i32, i32) {
    %c0_i32 = arith.constant 0 : i32
    %c0_i32_0 = arith.constant 0 : i32
    %c0_i32_1 = arith.constant 0 : i32
    return %c0_i32, %c0_i32_0 : i32, i32
  }
  func.func @transform_5(%arg0: i32, %arg1: i32) -> (i32, i32) {
    %c0_i32 = arith.constant 0 : i32
    %c0_i32_0 = arith.constant 0 : i32
    return %arg0, %c0_i32 : i32, i32
  }
}

</mosaic_0001>

<bundles_post_ra>
// kernel: tpu_custom_call.1
= control target key start
LH: loop header
LB: loop body
LE: loop exit
PB: predicated region body
PF: predicated region fallthrough
CT: control target
= control target key end

     0   :  { %10 = vsyncpa [#allocation4], 0  ;;  %s492_s0 = inlined_call_operand.hbm [shape: f32[2,4,256], index: 0, kind: input, shape index: {}]   ;;  %s493_s1 = inlined_call_operand.hbm [shape: f32[4,8], index: 1, kind: input, shape index: {}]   ;;  %s494_s2 = inlined_call_operand.vmem [shape: f32[1,8], index: 2, kind: input, shape index: {}]   ;;  %s495_s3 = inlined_call_operand.hbm [shape: f32[8,128], index: 3, kind: input, shape index: {}]   ;;  %s496_s4 = inlined_call_operand.vmem [shape: f32[1,128], index: 4, kind: input, shape index: {}]   ;;  %s497_s5 = inlined_call_operand.hbm [shape: f32[2,128], index: 5, kind: output, shape index: {}]  }
   0x1   :  { %11 = vsyncpa [#allocation7], 0 }
   0x2   :  { %12 = vsyncpa [#allocation5], 0  ;;  %s429_s18 = smov [#allocation6]   ;;  %s430_s20 = smov [#allocation3]  }
   0x3   :  { %s31_s19 = sshll.u32 %s429_s18, 4  ;;  %s18_s21 = sshll.u32 %s430_s20, 4  ;;  %s32_s19 = int_to_ptr.vmem [resolvable:$true] %s31_s19  ;;  %s19_s21 = int_to_ptr.vmem [resolvable:$true] %s18_s21 }
   0x4   :  { %s351_s22 = scalar_lea.vmem %s32_s19, 64  ;;  %p356_p1 = scmp.lt.s32.totalorder %s32_s19, %s32_s19 }
   0x5   :  { %p352_p0 = scmp.ne.s32.totalorder %s32_s19, %s351_s22  ;;  %p357_p2 = scmp.lt.s32.totalorder %s351_s22, %s351_s22 }
   0x7   :  { %p358_p3 = por %p357_p2, %p356_p1 }
   0x9   :  { %p359_p4 = pnand %p358_p3, %p352_p0 }
   0xb   :  { %362 = shalt.err (!%p359_p4)
}
   0xc   :  { %34 = dma.hbm_to_vmem [thread:$0]  %s493_s1, 64, %s32_s19, [#allocation7]  }
   0xd   :  { %s371_s25 = scalar_lea.vmem %s19_s21, 256  ;;  %p376_p6 = scmp.lt.s32.totalorder %s19_s21, %s19_s21 }
   0xe   :  { %p372_p5 = scmp.ne.s32.totalorder %s19_s21, %s371_s25  ;;  %p377_p7 = scmp.lt.s32.totalorder %s371_s25, %s371_s25 }
  0x10   :  { %p378_p8 = por %p377_p7, %p376_p6 }
  0x12   :  { %p379_p9 = pnand %p378_p8, %p372_p5 }
  0x14   :  { %382 = shalt.err (!%p379_p9)
}
  0x15   :  { %s431_s26 = smov 128   ;;  %s432_s27 = smov 8  }
  0x16   :  { %24 = dma.hbm_to_vmem [thread:$0]  %s492_s0, 256, %s19_s21, [#allocation4], %s431_s26, %s431_s26, %s432_s27  }
  0x17   :  { %s433_s30 = smov [#allocation8]  }
  0x18   :  { %s43_s6 = sshll.u32 %s433_s30, 4  ;;  %s44_s6 = int_to_ptr.vmem [resolvable:$true] %s43_s6 }
  0x19   :  { %s391_s7 = scalar_lea.vmem %s44_s6, 128  ;;  %p396_p11 = scmp.lt.s32.totalorder %s44_s6, %s44_s6 }
  0x1a   :  { %p392_p10 = scmp.ne.s32.totalorder %s44_s6, %s391_s7  ;;  %p397_p12 = scmp.lt.s32.totalorder %s391_s7, %s391_s7 }
  0x1c   :  { %p398_p13 = por %p397_p12, %p396_p11 }
  0x1e   :  { %p399_p0 = pnand %p398_p13, %p392_p10 }
  0x20   :  { %402 = shalt.err (!%p399_p0)
}
  0x21   :  { %46 = dma.hbm_to_vmem [thread:$0]  %s495_s3, 128, %s44_s6, [#allocation7]  }
  0x22   :  { %423 = dma.done.wait [#allocation4], 256  }
  0x23   :  { %424 = vsyncadd [#allocation4], 4294967040 }
  0x24   :  { %425 = dma.done.wait [#allocation7], 192  }
  0x25   :  { %426 = vsyncadd [#allocation7], 4294967104  ;;  %vm73_vm0 = vcmask 1043456   ;;  %v65_v0 = vld [vmem:[#allocation3] sm:$0xff]  ;;  %v66_v1 = vld [vmem:[#allocation3 + $0x8] sm:$0xff]  ;;  %vm62_vm1 = vcmask 25600   ;;  %v86_v12 = vlaneseq }
  0x26   :  { %v69_v2 = vcombine.high %v65_v0, %v65_v0  ;;  %v74_v3 = vsel %vm73_vm0, %v65_v0, 0.0  ;;  %v70_v4 = vcombine.high %v66_v1, %v66_v1  ;;  %v79_v6 = vsel %vm73_vm0, %v66_v1, 0.0  ;;  %v107_v11 = vld [vmem:[#allocation6] sm:$0xf]  ;;  %v199_v25 = vld [vmem:[#allocation8] sm:$0xff] }
  0x27   :  { %v434_v10 = vmov 0.0   ;;  %vm435_vm2 = vmmov 0   ;;  %v87_v13 = vand.u32 127, %v86_v12  ;;  %v89_v14 = vshrl.u32 %v86_v12, 7  ;;  %v304_v26 = vld [vmem:[%s494_s2] ss:$0 sm:$0xff] }
  0x28   :  { %v75_v5 = vsel %vm73_vm0, %v69_v2, 0.0  ;;  %v80_v7 = vsel %vm73_vm0, %v70_v4, 0.0  ;;  %63 = vst.msk [vmem:[#allocation2] sm:$0x3] %vm62_vm1, %v434_v10  ;;  %315 = vmatprep.subr.mxu0 %v434_v10  ;;  %320 = vmatprep.subr.mxu1 %v434_v10  ;;  %vm96_vm3 = vcmask 1041409   ;;  %vm115_vm4 = vcmask 31744  }
  0x29   :  { %v76_v8 = vadd.f32 %v75_v5, %v74_v3  ;;  %v81_v9 = vadd.f32 %v80_v7, %v79_v6  ;;  %316 = vmatpush3.msk.msra.mxu0 %vm73_vm0, %v107_v11  ;;  %317 = vmatprep.mubr.msk.f32.mxu0 %vm435_vm2, %v434_v10  ;;  %v90_v16 = vsub.s32 %v87_v13, %v89_v14  ;;  %vm207_vm5 = vcmask 64512   ;;  %v308_v35 = vld [vmem:[%s496_s4] ss:$0 sm:$0xff]  ;;  %s436_s2 = smov [#allocation9]  }
  0x2a   :  { %322 = vmatprep.mubr.msk.f32.mxu1 %vm435_vm2, %v434_v10  ;;  %321 = vmatpush3.msra.mxu1 %v199_v25  ;;  %s294_s11 = sshll.u32 %s436_s2, 4  ;;  %s295_s11 = int_to_ptr.vmem [resolvable:$true] %s294_s11 }
  0x2b   :  { %77 = vadd.xlane.f32.xlu0 %v76_v8  ;;  %s403_s12 = scalar_lea.vmem %s295_s11, 32  ;;  %p408_p2 = scmp.lt.s32.totalorder %s295_s11, %s295_s11 }
  0x2c   :  { %p404_p1 = scmp.ne.s32.totalorder %s295_s11, %s403_s12  ;;  %p409_p3 = scmp.lt.s32.totalorder %s403_s12, %s403_s12 }
  0x2e   :  { %p410_p4 = por %p409_p3, %p408_p2 }
  0x2f   :  { %82 = vadd.xlane.f32.xlu0 %v81_v9  ;;  %v64_v20 = vld [vmem:[#allocation2] sm:$0x3] }
  0x30   :  { %p411_p5 = pnand %p410_p4, %p404_p1 }
  0xb4   :  { %v78_v15 = vpop.xlane.xlu0 %77 }
  0xb5   :  { %v91_v18 = vrot.slane %v78_v15, %v90_v16 }
  0xb8   :  { %v83_v17 = vpop.xlane.xlu0 %82 }
  0xb9   :  { %v95_v19 = vrot.slane %v83_v17, %v90_v16 }
  0xbb   :  { %v97_v21 = vsel %vm96_vm3, %v95_v19, %v91_v18 }
  0xbc   :  { %v99_v22 = vadd.f32 %v97_v21, %v64_v20 }
  0xbe   :  { %101 = vst.msk [vmem:[#allocation2] sm:$0x3] %vm62_vm1, %v99_v22 }
  0xc5   :  { %v105_v23 = vld [vmem:[#allocation2] sm:$0x3] }
  0xc6   :  { %v106_v24 = vmul.f32 0.00390625, %v105_v23 }
  0xc8   :  { %318 = vmatmul.mubr.msk.f32.vlgmr.msra.gmra.mxu0 %vm115_vm4, %v106_v24 }
 0x188   :  { %v188_v27 = vpop.f32.mrf.mxu0 }
 0x189   :  { %v189_v28 = vadd.f32 %v304_v26, %v188_v27 }
 0x18a   :  { %v319_v29 = vpop.f32.mrf.mxu0 }
 0x18b   :  { %v307_v30 = vmul.f32 -1.442695, %v189_v28 }
 0x18d   :  { %335 = vpow2.f32 %v307_v30 }
 0x19a   :  { %v336_v31 = vpop.eup %335 }
 0x19b   :  { %v195_v32 = vadd.f32 1.0, %v336_v31 }
 0x19d   :  { %337 = vrcp.f32 %v195_v32 }
 0x1aa   :  { %v338_v33 = vpop.eup %337 }
 0x1ab   :  { %v198_v34 = vmul.f32 %v338_v33, %v189_v28 }
 0x1ad   :  { %323 = vmatmul.mubr.msk.f32.vlgmr.msra.gmra.mxu1 %vm207_vm5, %v198_v34 }
 0x26d   :  { %v277_v36 = vpop.f32.mrf.mxu1 }
 0x26e   :  { %v278_v37 = vadd.f32 %v308_v35, %v277_v36 }
 0x26f   :  { %v324_v38 = vpop.f32.mrf.mxu1 }
 0x270   :  { %v310_v39 = vmul.f32 -1.442695, %v278_v37 }
 0x272   :  { %339 = vpow2.f32 %v310_v39 }
 0x27f   :  { %v340_v40 = vpop.eup %339 }
 0x280   :  { %v284_v41 = vadd.f32 1.0, %v340_v40 }
 0x282   :  { %341 = vrcp.f32 %v284_v41 }
 0x28f   :  { %v342_v42 = vpop.eup %341 }
 0x290   :  { %287 = vst [vmem:[#allocation9] sm:$0x3] %v342_v42 }
 0x291   :  { %414 = shalt.err (!%p411_p5)
}
 0x292   :  { %297 = dma.vmem_to_hbm [thread:$0]  %s295_s11, 32, %s497_s5, [#allocation5]  }
 0x293   :  { %427 = dma.done.wait [#allocation5], 32  }
 0x294   :  { %428 = vsyncadd [#allocation5], 4294967264 }
 0x295   :  { %301 = vsyncpa [#allocation4], 1 }
 0x296   :  { %302 = vsyncpa [#allocation7], 1 }
 0x297   :  { %303 = vsyncpa [#allocation5], 1 }

</bundles_post_ra>
